<compile_context>
chip_gen: v5e
topology: v5e:2x2
jax: 0.10.0
libtpu: 0.0.40
codegen_flags: <defaults>
</compile_context>

<pallas_src>
import functools

import numpy as np
import jax
import jax.numpy as jnp
from jax import lax
from jax.experimental import pallas as pl
from jax.experimental.pallas import tpu as pltpu


def _freq_contrastive_kernel(avg_ref, feat_ref, loss_ref, acc_ref, *,
                             n_half, n_pad, inv_per, temperature):
    """Fused class-center + NT-Xent contrastive loss (reduction over 4B rows).

    avg_ref  : (M, TK)  bf16 0/1 group-selection matrix tile (M = 2*n_pad)
    feat_ref : (TK, D)  bf16 raw feature tile
    loss_ref : (1, 1)   f32 scalar loss output
    acc_ref  : (M, D)   f32 accumulator scratch (group sums)
    """
    k = pl.program_id(0)

    @pl.when(k == 0)
    def _init():
        acc_ref[...] = jnp.zeros_like(acc_ref)

    # Group sums of all four quarters: one bf16 MXU matmul per row tile,
    # accumulated in f32.
    acc_ref[...] += jnp.dot(avg_ref[...], feat_ref[...],
                            preferred_element_type=jnp.float32)

    @pl.when(k == pl.num_programs(0) - 1)
    def _epilogue():
        m_rows = 2 * n_pad
        inv_t = jnp.float32(1.0 / temperature)

        centers = acc_ref[...] * jnp.float32(inv_per)            # (M, D) means
        # F.normalize(dim=1): x / max(||x||, eps)
        sq = jnp.sum(centers * centers, axis=-1, keepdims=True)  # (M, 1)
        inv_norm = 1.0 / jnp.maximum(jnp.sqrt(sq), 1e-12)
        reps = centers * inv_norm                                # (M, D)

        # Validity masks (exclude sublane-padding rows/cols; all-ones when
        # n_half is already a multiple of 8).
        row_i = lax.broadcasted_iota(jnp.int32, (m_rows, 1), 0)
        row_valid = (jnp.where(row_i < n_pad, row_i, row_i - n_pad)
                     < n_half).astype(jnp.float32)               # (M, 1)
        col_i = lax.broadcasted_iota(jnp.int32, (1, m_rows), 1)
        col_valid = (jnp.where(col_i < n_pad, col_i, col_i - n_pad)
                     < n_half).astype(jnp.float32)               # (1, M)
        half_i = lax.broadcasted_iota(jnp.int32, (n_pad, 1), 0)
        half_valid = (half_i < n_half).astype(jnp.float32)       # (n_pad, 1)

        # Positives: sim[i, (i+n) mod 2n] == dot(emb1_i, emb2_i) for both
        # halves, so one (n_pad, D) elementwise mul + row reduce covers all
        # 2*n_half rows (padded rows masked out).  n_pad-aligned slices.
        pos = jnp.sum(reps[:n_pad] * reps[n_pad:], axis=-1, keepdims=True)
        pos_sum = jnp.sum(pos * half_valid, keepdims=True)       # (1, 1)

        # Cosine similarity of unit-norm rows: contract the LAST dims of both
        # operands (no transpose, no concat).
        sim = lax.dot_general(reps, reps,
                              dimension_numbers=(((1,), (1,)), ((), ())),
                              preferred_element_type=jnp.float32)  # (M, M)
        exp_sim = jnp.exp(sim * inv_t) * col_valid               # mask pad cols

        # Denominator = rowsum(exp(sim/t)) - exp(self_sim/t); self_sim from
        # already-available scalars (no extra (M, D) multiply / row reduce).
        self_sim = sq * (inv_norm * inv_norm)                    # (M, 1) ~ 1
        denom = jnp.sum(exp_sim, axis=-1, keepdims=True) - jnp.exp(self_sim * inv_t)
        denom = jnp.maximum(denom, jnp.float32(1e-30))

        # loss_i = log(denom_i) - pos_i / t ; padded rows masked out.
        log_sum = jnp.sum(jnp.log(denom) * row_valid, keepdims=True)  # (1, 1)
        total = log_sum - (2.0 * inv_t) * pos_sum
        loss_ref[...] = total * jnp.float32(1.0 / (2 * n_half))


def _choose_row_tile(rows, d, m_rows, budget_bytes=16 * 1024 * 1024):
    """Pick a row-tile TK for the 4B reduction axis.

    Keeps double-buffered bf16 input tiles plus the f32 accumulator and the
    small epilogue temporaries under `budget_bytes` (fits the default scoped
    VMEM on v5e/v6e/v7x, with vmem_limit_bytes giving extra headroom).
    TK is either the full row extent or a multiple of 128 that divides it.
    """
    fixed = m_rows * d * 4 + 4 * m_rows * m_rows * 4      # accumulator + epilogue temps
    per_row = 2 * (d * 2) + 2 * (m_rows * 2)              # dbl-buffered feat + avg cols (bf16)
    cap = max(128, (budget_bytes - fixed) // max(per_row, 1))
    if rows <= cap:
        return rows
    tk = (cap // 128) * 128
    while tk >= 128:
        if rows % tk == 0:
            return tk
        tk -= 128
    # TODO(synk): rows > VMEM cap but no 128-multiple divisor of rows exists;
    # fall back to a single un-tiled block (pad rows in the wrapper if needed).
    return rows


def frequency_contrastive_loss(feat1, labels, temperature=0.5):
    """JAX/Pallas equivalent of Frequency_ContrastiveLoss.forward."""
    total_rows, d = feat1.shape
    assert total_rows % 4 == 0
    b = total_rows // 4

    # TODO(synk): lb_num = labels.unique() is computed host-side (np.unique) at
    # trace time, so labels must be concrete (cannot jit over labels).
    # NOTE: like the PyTorch module's chunk()-based centers, this assumes each
    # quarter's labels form contiguous, equal-size groups of `per` rows.
    lb_num = int(len(np.unique(np.asarray(labels[:b]))))
    per = b // lb_num
    n_half = 2 * lb_num                       # rows of emb1 (== rows of emb2)
    n_pad = ((n_half + 7) // 8) * 8           # sublane-aligned half size
    m_rows = 2 * n_pad

    # Static 0/1 block-diagonal group-selection matrix (means via the 1/per
    # scale inside the kernel, so bf16 entries stay exact):
    #   rows [0, n_half)              -> emb1 centers (quarters ft_v, ft_n)
    #   rows [n_pad, n_pad + n_half)  -> emb2 centers (quarters ft_v1, ft_n1)
    # Padded rows duplicate a real row (benign) and are masked out in-kernel.
    avg = np.zeros((m_rows, 4 * b), dtype=np.float32)
    for half in range(2):
        base = half * n_pad
        for qi in range(2):
            q = 2 * half + qi
            for g in range(lb_num):
                avg[base + qi * lb_num + g,
                    q * b + g * per: q * b + (g + 1) * per] = 1.0
        for r in range(base + n_half, base + n_pad):
            avg[r] = avg[base]
    avg = jnp.asarray(avg, dtype=jnp.bfloat16)

    # Feed the MXU in bf16 (halves the dominant HBM read); f32 accumulation in
    # the kernel.  No feature-dim padding: the feat BlockSpec's last dim equals
    # the full array extent, which is legal on TPU.
    feat = feat1 if feat1.dtype == jnp.bfloat16 else feat1.astype(jnp.bfloat16)

    rows = 4 * b
    tk = _choose_row_tile(rows, d, m_rows)
    num_k = max(1, rows // tk)

    feat_spec = pl.BlockSpec((tk, d), lambda k: (k, 0))
    if (num_k >= 3 and
            3 * tk * d * 2 + 2 * m_rows * tk * 2 + m_rows * d * 4
            <= 24 * 1024 * 1024):
        # Deeper feat pipeline hides DMA start-up when the per-tile matmul is
        # short (small M); only when it still fits the VMEM budget (v7x-safe).
        feat_spec = pl.BlockSpec((tk, d), lambda k: (k, 0),
                                 pipeline_mode=pl.Buffered(3))

    kernel = functools.partial(
        _freq_contrastive_kernel,
        n_half=n_half, n_pad=n_pad, inv_per=1.0 / per,
        temperature=float(temperature))

    out = pl.pallas_call(
        kernel,
        out_shape=jax.ShapeDtypeStruct((1, 1), jnp.float32),
        grid=(num_k,),
        in_specs=[
            pl.BlockSpec((m_rows, tk), lambda k: (0, k)),   # avg (col tiles)
            feat_spec,                                      # feat (row tiles)
        ],
        out_specs=pl.BlockSpec((1, 1), lambda k: (0, 0)),
        scratch_shapes=[pltpu.VMEM((m_rows, d), jnp.float32)],
        compiler_params=pltpu.CompilerParams(
            dimension_semantics=("arbitrary",),
            vmem_limit_bytes=32 * 1024 * 1024),
    )(avg, feat)
    return out[0, 0]


def _reference_loss(feat1, labels, temperature=0.5):
    # Pure-JAX mirror of the PyTorch math, for a sanity check.
    total = feat1.shape[0]
    b = total // 4
    ft_v, ft_n, ft_v1, ft_n1 = (feat1[i * b:(i + 1) * b] for i in range(4))
    lb_num = int(len(np.unique(np.asarray(labels[:b]))))
    per = b // lb_num
    c = lambda f: jnp.mean(f.reshape(lb_num, per, f.shape[-1]), axis=1)
    emb1 = jnp.concatenate([c(ft_v), c(ft_n)], axis=0)
    emb2 = jnp.concatenate([c(ft_v1), c(ft_n1)], axis=0)
    n = emb1.shape[0]
    z1 = emb1 / jnp.maximum(jnp.linalg.norm(emb1, axis=1, keepdims=True), 1e-12)
    z2 = emb2 / jnp.maximum(jnp.linalg.norm(emb2, axis=1, keepdims=True), 1e-12)
    reps = jnp.concatenate([z1, z2], axis=0)
    sim = reps @ reps.T
    idx = jnp.arange(2 * n)
    positives = sim[idx, (idx + n) % (2 * n)]
    neg_mask = 1.0 - jnp.eye(2 * n)
    denom = jnp.sum(neg_mask * jnp.exp(sim / temperature), axis=1)
    loss_partial = -jnp.log(jnp.exp(positives / temperature) / denom)
    return jnp.sum(loss_partial) / (2 * n)


if __name__ == "__main__":
    key = jax.random.PRNGKey(0)
    lb_num = 4          # unique labels per quarter
    per = 2             # samples per label
    B = lb_num * per    # 8 rows per quarter
    D = 32              # feature dim

    feat1 = jax.random.normal(key, (4 * B, D), dtype=jnp.float32)
    lb_quarter = jnp.repeat(jnp.arange(lb_num, dtype=jnp.int32), per)
    labels = jnp.tile(lb_quarter, 4)            # (32,)

    loss = frequency_contrastive_loss(feat1, labels, temperature=0.5)
    loss = jax.block_until_ready(loss)

    # Tight check: reference fed the same bf16-quantized features as the MXU.
    ref_bf16 = _reference_loss(feat1.astype(jnp.bfloat16).astype(jnp.float32),
                               labels, temperature=0.5)
    np.testing.assert_allclose(np.asarray(loss), np.asarray(ref_bf16),
                               rtol=1e-4, atol=1e-4)
    # Loose check: full-f32 reference (only bf16 feature-quantization drift).
    ref_f32 = _reference_loss(feat1, labels, temperature=0.5)
    np.testing.assert_allclose(np.asarray(loss), np.asarray(ref_f32),
                               rtol=5e-2, atol=5e-2)

    print("KERNEL_OK")
</pallas_src>

<mosaic_0001>
module attributes {stable_mosaic.version = 11 : i64} {
  func.func @_freq_contrastive_kernel(%arg0: i32, %arg1: memref<16x32xbf16, #tpu.memory_space<vmem>>, %arg2: memref<32x32xbf16, #tpu.memory_space<vmem>>, %arg3: memref<1x1xf32, #tpu.memory_space<vmem>>, %arg4: memref<16x32xf32, #tpu.memory_space<vmem>>) attributes {dimension_semantics = [#tpu.dimension_semantics<arbitrary>], iteration_bounds = array<i64: 1>, scalar_prefetch = 0 : i64, scratch_operands = 1 : i64, tpu.core_type = #tpu.core_type<tc>, window_params = [{transform_indices = @transform_0, window_bounds = array<i64: 16, 32>}, {transform_indices = @transform_1, window_bounds = array<i64: 32, 32>}, {pipeline_mode = #tpu.pipeline_mode<synchronous>, transform_indices = @transform_2, window_bounds = array<i64: 1, 1>}]} {
    %c0_i32 = arith.constant 0 : i32
    %0 = arith.cmpi eq, %arg0, %c0_i32 : i32
    %1 = arith.extui %0 : i1 to i32
    %c0_i32_0 = arith.constant 0 : i32
    %2 = arith.cmpi ne, %1, %c0_i32_0 : i32
    scf.if %2 {
      %cst_10 = arith.constant 0.000000e+00 : f32
      %12 = vector.broadcast %cst_10 : f32 to vector<16x32xf32>
      %c0_11 = arith.constant 0 : index
      %c0_12 = arith.constant 0 : index
      %13 = vector.load %arg4[%c0_11, %c0_12] : memref<16x32xf32, #tpu.memory_space<vmem>>, vector<16x32xf32>
      tpu.vector_store %arg4[%c0_11, %c0_12], %12 {strides = array<i32>} : memref<16x32xf32, #tpu.memory_space<vmem>>, vector<16x32xf32>,
    } else {
    }
    %c0 = arith.constant 0 : index
    %c0_1 = arith.constant 0 : index
    %3 = vector.load %arg4[%c0, %c0_1] : memref<16x32xf32, #tpu.memory_space<vmem>>, vector<16x32xf32>
    %c0_2 = arith.constant 0 : index
    %c0_3 = arith.constant 0 : index
    %4 = vector.load %arg1[%c0_2, %c0_3] : memref<16x32xbf16, #tpu.memory_space<vmem>>, vector<16x32xbf16>
    %c0_4 = arith.constant 0 : index
    %c0_5 = arith.constant 0 : index
    %5 = vector.load %arg2[%c0_4, %c0_5] : memref<32x32xbf16, #tpu.memory_space<vmem>>, vector<32x32xbf16>
    %cst = arith.constant dense<0.000000e+00> : vector<16x32xf32>
    %6 = tpu.matmul %4, %5, %cst {dimension_numbers = #tpu.dot_dimension_numbers<[1], [0], [0], [1], [0, 0, 1, 1], [], []>} : vector<16x32xbf16>, vector<32x32xbf16>, vector<16x32xf32> -> vector<16x32xf32>
    %7 = arith.addf %3, %6 : vector<16x32xf32>
    %c0_6 = arith.constant 0 : index
    %c0_7 = arith.constant 0 : index
    %8 = vector.load %arg4[%c0_6, %c0_7] : memref<16x32xf32, #tpu.memory_space<vmem>>, vector<16x32xf32>
    tpu.vector_store %arg4[%c0_6, %c0_7], %7 {strides = array<i32>} : memref<16x32xf32, #tpu.memory_space<vmem>>, vector<16x32xf32>,
    %c0_i32_8 = arith.constant 0 : i32
    %9 = arith.cmpi eq, %arg0, %c0_i32_8 : i32
    %10 = arith.extui %9 : i1 to i32
    %c0_i32_9 = arith.constant 0 : i32
    %11 = arith.cmpi ne, %10, %c0_i32_9 : i32
    scf.if %11 {
      %c0_10 = arith.constant 0 : index
      %c0_11 = arith.constant 0 : index
      %12 = vector.load %arg4[%c0_10, %c0_11] : memref<16x32xf32, #tpu.memory_space<vmem>>, vector<16x32xf32>
      %cst_12 = arith.constant 5.000000e-01 : f32
      %13 = vector.broadcast %cst_12 : f32 to vector<16x32xf32>
      %14 = arith.mulf %12, %13 : vector<16x32xf32>
      %15 = arith.mulf %14, %14 : vector<16x32xf32>
      %cst_13 = arith.constant dense<0.000000e+00> : vector<16xf32>
      %16 = vector.multi_reduction <add>, %15, %cst_13 [1] : vector<16x32xf32> to vector<16xf32>
      %17 = vector.shape_cast %16 : vector<16xf32> to vector<16x1xf32>
      %18 = math.sqrt %17 : vector<16x1xf32>
      %cst_14 = arith.constant 9.99999996E-13 : f32
      %19 = vector.broadcast %cst_14 : f32 to vector<16x1xf32>
      %20 = arith.maximumf %18, %19 : vector<16x1xf32>
      %cst_15 = arith.constant 1.000000e+00 : f32
      %21 = vector.broadcast %cst_15 : f32 to vector<16x1xf32>
      %22 = arith.divf %21, %20 : vector<16x1xf32>
      %23 = vector.broadcast %22 : vector<16x1xf32> to vector<16x32xf32>
      %24 = arith.mulf %14, %23 : vector<16x32xf32>
      %25 = tpu.iota {dimensions = array<i32: 0>} : vector<16x1xi32>
      %c8_i32 = arith.constant 8 : i32
      %26 = vector.broadcast %c8_i32 : i32 to vector<16x1xi32>
      %27 = arith.cmpi slt, %25, %26 : vector<16x1xi32>
      %c8_i32_16 = arith.constant 8 : i32
      %28 = vector.broadcast %c8_i32_16 : i32 to vector<16x1xi32>
      %29 = arith.subi %25, %28 : vector<16x1xi32>
      %30 = arith.select %27, %25, %29 : vector<16x1xi1>, vector<16x1xi32>
      %c8_i32_17 = arith.constant 8 : i32
      %31 = vector.broadcast %c8_i32_17 : i32 to vector<16x1xi32>
      %32 = arith.cmpi slt, %30, %31 : vector<16x1xi32>
      %33 = arith.extui %32 : vector<16x1xi1> to vector<16x1xi32>
      %34 = arith.sitofp %33 : vector<16x1xi32> to vector<16x1xf32>
      %35 = tpu.iota {dimensions = array<i32: 1>} : vector<1x16xi32>
      %c8_i32_18 = arith.constant 8 : i32
      %36 = vector.broadcast %c8_i32_18 : i32 to vector<1x16xi32>
      %37 = arith.cmpi slt, %35, %36 : vector<1x16xi32>
      %c8_i32_19 = arith.constant 8 : i32
      %38 = vector.broadcast %c8_i32_19 : i32 to vector<1x16xi32>
      %39 = arith.subi %35, %38 : vector<1x16xi32>
      %40 = arith.select %37, %35, %39 : vector<1x16xi1>, vector<1x16xi32>
      %c8_i32_20 = arith.constant 8 : i32
      %41 = vector.broadcast %c8_i32_20 : i32 to vector<1x16xi32>
      %42 = arith.cmpi slt, %40, %41 : vector<1x16xi32>
      %43 = arith.extui %42 : vector<1x16xi1> to vector<1x16xi32>
      %44 = arith.sitofp %43 : vector<1x16xi32> to vector<1x16xf32>
      %45 = tpu.iota {dimensions = array<i32: 0>} : vector<8x1xi32>
      %c8_i32_21 = arith.constant 8 : i32
      %46 = vector.broadcast %c8_i32_21 : i32 to vector<8x1xi32>
      %47 = arith.cmpi slt, %45, %46 : vector<8x1xi32>
      %48 = arith.extui %47 : vector<8x1xi1> to vector<8x1xi32>
      %49 = arith.sitofp %48 : vector<8x1xi32> to vector<8x1xf32>
      %50 = vector.extract_strided_slice %24 {offsets = [0, 0], sizes = [8, 32], strides = [1, 1]} : vector<16x32xf32> to vector<8x32xf32>
      %51 = vector.extract_strided_slice %24 {offsets = [8, 0], sizes = [8, 32], strides = [1, 1]} : vector<16x32xf32> to vector<8x32xf32>
      %52 = arith.mulf %50, %51 : vector<8x32xf32>
      %cst_22 = arith.constant dense<0.000000e+00> : vector<8xf32>
      %53 = vector.multi_reduction <add>, %52, %cst_22 [1] : vector<8x32xf32> to vector<8xf32>
      %54 = vector.shape_cast %53 : vector<8xf32> to vector<8x1xf32>
      %55 = arith.mulf %54, %49 : vector<8x1xf32>
      %56 = vector.shape_cast %55 : vector<8x1xf32> to vector<1x8x1xf32>
      %cst_23 = arith.constant dense<0.000000e+00> : vector<1xf32>
      %57 = vector.multi_reduction <add>, %56, %cst_23 [1, 2] : vector<1x8x1xf32> to vector<1xf32>
      %58 = vector.shape_cast %57 : vector<1xf32> to vector<1x1x1xf32>
      %59 = vector.extract %58[0, 0, 0] : f32 from vector<1x1x1xf32>
      %60 = vector.broadcast %59 : f32 to vector<1x1xf32>
      %cst_24 = arith.constant dense<0.000000e+00> : vector<16x16xf32>
      %61 = tpu.matmul %24, %24, %cst_24 {dimension_numbers = #tpu.dot_dimension_numbers<[1], [1], [0], [0], [0, 0, 1, 0], [], []>} : vector<16x32xf32>, vector<16x32xf32>, vector<16x16xf32> -> vector<16x16xf32>
      %cst_25 = arith.constant 2.000000e+00 : f32
      %62 = vector.broadcast %cst_25 : f32 to vector<16x16xf32>
      %63 = arith.mulf %61, %62 : vector<16x16xf32>
      %64 = math.exp %63 : vector<16x16xf32>
      %65 = vector.broadcast %44 : vector<1x16xf32> to vector<16x16xf32>
      %66 = arith.mulf %64, %65 : vector<16x16xf32>
      %67 = arith.mulf %22, %22 : vector<16x1xf32>
      %68 = arith.mulf %17, %67 : vector<16x1xf32>
      %cst_26 = arith.constant dense<0.000000e+00> : vector<16xf32>
      %69 = vector.multi_reduction <add>, %66, %cst_26 [1] : vector<16x16xf32> to vector<16xf32>
      %70 = vector.shape_cast %69 : vector<16xf32> to vector<16x1xf32>
      %cst_27 = arith.constant 2.000000e+00 : f32
      %71 = vector.broadcast %cst_27 : f32 to vector<16x1xf32>
      %72 = arith.mulf %68, %71 : vector<16x1xf32>
      %73 = math.exp %72 : vector<16x1xf32>
      %74 = arith.subf %70, %73 : vector<16x1xf32>
      %cst_28 = arith.constant 1.000000e-30 : f32
      %75 = vector.broadcast %cst_28 : f32 to vector<16x1xf32>
      %76 = arith.maximumf %74, %75 : vector<16x1xf32>
      %77 = math.log %76 : vector<16x1xf32>
      %78 = arith.mulf %77, %34 : vector<16x1xf32>
      %79 = vector.shape_cast %78 : vector<16x1xf32> to vector<1x16x1xf32>
      %cst_29 = arith.constant dense<0.000000e+00> : vector<1xf32>
      %80 = vector.multi_reduction <add>, %79, %cst_29 [1, 2] : vector<1x16x1xf32> to vector<1xf32>
      %81 = vector.shape_cast %80 : vector<1xf32> to vector<1x1x1xf32>
      %82 = vector.extract %81[0, 0, 0] : f32 from vector<1x1x1xf32>
      %83 = vector.broadcast %82 : f32 to vector<1x1xf32>
      %cst_30 = arith.constant 2.000000e+00 : f32
      %cst_31 = arith.constant 2.000000e+00 : f32
      %84 = arith.mulf %cst_30, %cst_31 : f32
      %85 = vector.broadcast %84 : f32 to vector<1x1xf32>
      %86 = arith.mulf %85, %60 : vector<1x1xf32>
      %87 = arith.subf %83, %86 : vector<1x1xf32>
      %cst_32 = arith.constant 6.250000e-02 : f32
      %88 = vector.broadcast %cst_32 : f32 to vector<1x1xf32>
      %89 = arith.mulf %87, %88 : vector<1x1xf32>
      %c0_33 = arith.constant 0 : index
      %c0_34 = arith.constant 0 : index
      %90 = vector.load %arg3[%c0_33, %c0_34] : memref<1x1xf32, #tpu.memory_space<vmem>>, vector<1x1xf32>
      tpu.vector_store %arg3[%c0_33, %c0_34], %89 {strides = array<i32>} : memref<1x1xf32, #tpu.memory_space<vmem>>, vector<1x1xf32>,
    } else {
    }
    return
  }
  func.func @transform_0(%arg0: i32) -> (i32, i32) {
    %c0_i32 = arith.constant 0 : i32
    %c0_i32_0 = arith.constant 0 : i32
    return %c0_i32, %arg0 : i32, i32
  }
  func.func @transform_1(%arg0: i32) -> (i32, i32) {
    %c0_i32 = arith.constant 0 : i32
    %c0_i32_0 = arith.constant 0 : i32
    return %arg0, %c0_i32 : i32, i32
  }
  func.func @transform_2(%arg0: i32) -> (i32, i32) {
    %c0_i32 = arith.constant 0 : i32
    %c0_i32_0 = arith.constant 0 : i32
    %c0_i32_1 = arith.constant 0 : i32
    return %c0_i32, %c0_i32_0 : i32, i32
  }
}

</mosaic_0001>

<bundles_post_ra>
// kernel: tpu_custom_call.1
= control target key start
LH: loop header
LB: loop body
LE: loop exit
PB: predicated region body
PF: predicated region fallthrough
CT: control target
= control target key end

     0   :  { %7 = vsyncpa [#allocation4], 0  ;;  %s507_s0 = inlined_call_operand.hbm [shape: bf16[16,32], index: 0, kind: input, shape index: {}]   ;;  %s508_s1 = inlined_call_operand.hbm [shape: bf16[32,32], index: 1, kind: input, shape index: {}]   ;;  %s509_s2 = inlined_call_operand.hbm [shape: f32[1,1], index: 2, kind: output, shape index: {}]  }
   0x1   :  { %8 = vsyncpa [#allocation7], 0 }
   0x2   :  { %9 = vsyncpa [#allocation5], 0  ;;  %s14_s11 = sshll.u32 %s507_s0, 4  ;;  %s444_s12 = smov [#allocation3]   ;;  %s15_s11 = int_to_ptr.hbm [resolvable:$true] %s14_s11 }
   0x3   :  { %s16_s13 = sshll.u32 %s444_s12, 4  ;;  %s27_s16 = sshll.u32 %s508_s1, 4  ;;  %s17_s13 = int_to_ptr.vmem [resolvable:$true] %s16_s13  ;;  %s28_s16 = int_to_ptr.hbm [resolvable:$true] %s27_s16 }
   0x4   :  { %s445_s17 = smov 64   ;;  %s446_s18 = smov 4  }
   0x5   :  { %22 = dma.hbm_to_vmem [thread:$0]  %s15_s11, 128, %s17_s13, [#allocation4], %s445_s17, %s445_s17, %s446_s18  }
   0x6   :  { %s447_s19 = smov [#allocation6]  }
   0x7   :  { %s29_s20 = sshll.u32 %s447_s19, 4  ;;  %s30_s20 = int_to_ptr.vmem [resolvable:$true] %s29_s20 }
   0x8   :  { %35 = dma.hbm_to_vmem [thread:$0]  %s28_s16, 256, %s30_s20, [#allocation7], %s445_s17, %s445_s17, %s446_s18  }
   0x9   :  { %438 = dma.done.wait [#allocation4], 128  }
   0xa   :  { %439 = vsyncadd [#allocation4], 4294967168 }
   0xb   :  { %440 = dma.done.wait [#allocation7], 256  }
   0xc   :  { %441 = vsyncadd [#allocation7], 4294967040  ;;  %vm49_vm0 = vcmask 261120   ;;  %v448_v0 = vmov 0.0   ;;  %v335_v1 = vld [vmem:[#allocation6 + $0x8] sm:$0xff]  ;;  %v334_v2 = vld [vmem:[#allocation6] sm:$0xff] }
   0xd   :  { %50 = vst.msk [vmem:[#allocation2] sm:$0xff] %vm49_vm0, %v448_v0  ;;  %87 = vmatpush.bf16.msra.mxu0 %v335_v1  ;;  %v333_v3 = vld [vmem:[#allocation3] sm:$0xff]  ;;  %vm201_vm13 = vcmask 7168   ;;  %s449_s21 = smov [#allocation8]   ;;  %s302_s25 = sshll.u32 %s509_s2, 4  ;;  %s303_s25 = int_to_ptr.hbm [resolvable:$true] %s302_s25 }
   0xe   :  { %51 = vst.msk [vmem:[#allocation2 + $0x8] sm:$0xff] %vm49_vm0, %v448_v0  ;;  %s300_s22 = sshll.u32 %s449_s21, 4  ;;  %s301_s22 = int_to_ptr.vmem [resolvable:$true] %s300_s22 }
  0x11   :  { %88 = vmatpush.bf16.msra.mxu0 %v334_v2 }
  0x14   :  { %325 = vmatmul.msk.bf16.vlgmr.msra.gmra.mxu0 %vm49_vm0, %v333_v3  ;;  %v52_v4 = vld [vmem:[#allocation2] sm:$0xff] }
  0x15   :  { %v53_v7 = vld [vmem:[#allocation2 + $0x8] sm:$0xff] }
  0x91   :  { %v90_v5 = vpop.f32.mrf.mxu0 }
  0x92   :  { %v95_v6 = vadd.f32 %v90_v5, %v52_v4 }
  0x94   :  { %97 = vst.msk [vmem:[#allocation2] sm:$0xff] %vm49_vm0, %v95_v6 }
  0x99   :  { %v92_v8 = vpop.f32.mrf.mxu0 }
  0x9a   :  { %v96_v9 = vadd.f32 %v92_v8, %v53_v7  ;;  %v186_v7 = vlaneseq }
  0x9b   :  { %v102_v12 = vld [vmem:[#allocation2] sm:$0xff] }
  0x9c   :  { %98 = vst.msk [vmem:[#allocation2 + $0x8] sm:$0xff] %vm49_vm0, %v96_v9  ;;  %v479_v15 = vmul.f32 0.5, %v102_v12  ;;  %v187_v8 = vand.u32 127, %v186_v7 }
  0x9e   :  { %v106_v16 = vmul.f32 %v479_v15, %v479_v15  ;;  %v327_v9 = vadd.s32 4294967288, %v187_v8  ;;  %vm188_vm14 = vcmp.lt.s32.totalorder %v187_v8, 8 }
  0xa0   :  { %v108_v17 = vsel %vm49_vm0, %v106_v16, 0.0 }
  0xa3   :  { %v103_v10 = vld [vmem:[#allocation2 + $0x8] sm:$0xff] }
  0xa4   :  { %v105_v11 = vmul.f32 0.5, %v103_v10 }
  0xa6   :  { %v107_v13 = vmul.f32 %v105_v11, %v105_v11 }
  0xa8   :  { %v111_v14 = vsel %vm49_vm0, %v107_v13, 0.0  ;;  %v190_v13 = vsel %vm188_vm14, %v187_v8, %v327_v9 }
  0xa9   :  { %112 = vadd.xlane.f32.xlu0 %v111_v14  ;;  %vm191_vm15 = vcmp.lt.s32.totalorder %v190_v13, 8 }
  0xaa   :  { %v328_v16 = vsel %vm191_vm15, 1.0, %v448_v0 }
  0xb1   :  { %109 = vadd.xlane.f32.xlu0 %v108_v17 }
 0x11c   :  { %v113_v18 = vpop.xlane.xlu0 %112 }
 0x11d   :  { %346 = vrsqrt.f32 %v113_v18  ;;  %vm133_vm1 = vcmp.eq.f32.partialorder %v113_v18, inf  ;;  %v136_v30 = vand.u32 2147483648, %v113_v18  ;;  %vm135_vm2 = vcmp.eq.f32.partialorder %v113_v18, 0.0 }
 0x123   :  { %v347_v19 = vpop.eup %346 }
 0x124   :  { %v127_v20 = vmul.f32 %v347_v19, %v113_v18  ;;  %v484_v21 = vpop.xlane.xlu0 %109 }
 0x125   :  { %348 = vrsqrt.f32 %v484_v21  ;;  %vm121_vm3 = vcmp.eq.f32.partialorder %v484_v21, inf  ;;  %v124_v38 = vand.u32 2147483648, %v484_v21  ;;  %vm123_vm4 = vcmp.eq.f32.partialorder %v484_v21, 0.0 }
 0x126   :  { %v128_v22 = vmul.f32 %v347_v19, %v127_v20 }
 0x128   :  { %v129_v23 = vmul.f32 0.5, %v128_v22 }
 0x12a   :  { %v130_v24 = vsub.f32 1.5, %v129_v23 }
 0x12b   :  { %v349_v25 = vpop.eup %348 }
 0x12c   :  { %v131_v26 = vmul.f32 %v347_v19, %v130_v24  ;;  %v115_v27 = vmul.f32 %v349_v25, %v484_v21 }
 0x12e   :  { %v132_v28 = vmul.f32 %v131_v26, %v113_v18  ;;  %v116_v29 = vmul.f32 %v349_v25, %v115_v27 }
 0x130   :  { %v134_v31 = vsel %vm133_vm1, %v113_v18, %v132_v28  ;;  %v117_v32 = vmul.f32 0.5, %v116_v29  ;;  %vm293_vm1 = vcmask 0  }
 0x131   :  { %v137_v33 = vsel %vm135_vm2, %v136_v30, %v134_v31 }
 0x132   :  { %v118_v34 = vsub.f32 1.5, %v117_v32  ;;  %v139_v35 = vmax.f32 %v137_v33, 1e-12 }
 0x134   :  { %v119_v36 = vmul.f32 %v349_v25, %v118_v34  ;;  %350 = vrcp.f32 %v139_v35  ;;  %v166_v45 = vand.u32 2147483648, %v139_v35  ;;  %v164_v47 = vand.u32 2147483647, %v139_v35 }
 0x135   :  { %vm160_vm6 = vweird.f32 %v139_v35 }
 0x136   :  { %v120_v37 = vmul.f32 %v119_v36, %v484_v21  ;;  %v167_v50 = vor.u32 1.1754944e-38, %v166_v45  ;;  %vm165_vm8 = vcmp.eq.f32.partialorder %v164_v47, 8.507059e+37 }
 0x138   :  { %v122_v39 = vsel %vm121_vm3, %v484_v21, %v120_v37 }
 0x139   :  { %v125_v40 = vsel %vm123_vm4, %v124_v38, %v122_v39 }
 0x13a   :  { %v351_v41 = vpop.eup %350  ;;  %v138_v42 = vmax.f32 %v125_v40, 1e-12 }
 0x13b   :  { %v156_v43 = vmul.f32 %v351_v41, %v139_v35  ;;  %vm161_vm5 = vweird.f32 %v351_v41 }
 0x13c   :  { %352 = vrcp.f32 %v138_v42  ;;  %vm162_vm7 = vmor %vm160_vm6, %vm161_vm5  ;;  %v151_v57 = vand.u32 2147483648, %v138_v42  ;;  %v149_v60 = vand.u32 2147483647, %v138_v42  ;;  %vm145_vm10 = vweird.f32 %v138_v42 }
 0x13d   :  { %v157_v44 = vsub.f32 1.0, %v156_v43 }
 0x13e   :  { %v152_v62 = vor.u32 1.1754944e-38, %v151_v57  ;;  %vm150_vm12 = vcmp.eq.f32.partialorder %v149_v60, 8.507059e+37 }
 0x13f   :  { %v158_v46 = vmul.f32 %v351_v41, %v157_v44 }
 0x141   :  { %v159_v48 = vadd.f32 %v351_v41, %v158_v46 }
 0x142   :  { %v353_v49 = vpop.eup %352 }
 0x143   :  { %v163_v51 = vsel %vm162_vm7, %v351_v41, %v159_v48  ;;  %v141_v52 = vmul.f32 %v353_v49, %v138_v42  ;;  %vm146_vm9 = vweird.f32 %v353_v49 }
 0x144   :  { %v168_v53 = vsel %vm165_vm8, %v167_v50, %v163_v51  ;;  %vm147_vm11 = vmor %vm145_vm10, %vm146_vm9 }
 0x145   :  { %v171_v54 = vmul.f32 %v168_v53, %v105_v11  ;;  %v251_v55 = vmul.f32 %v168_v53, %v168_v53  ;;  %v142_v56 = vsub.f32 1.0, %v141_v52 }
 0x147   :  { %329 = vmatpush.xpose.msk.msra.mxu1 %vm49_vm0, %v171_v54  ;;  %v253_v58 = vmul.f32 %v251_v55, %v113_v18  ;;  %v143_v59 = vmul.f32 %v353_v49, %v142_v56 }
 0x149   :  { %v144_v61 = vadd.f32 %v353_v49, %v143_v59  ;;  %v262_v35 = vmul.f32 2.0, %v253_v58 }
 0x14b   :  { %v148_v63 = vsel %vm147_vm11, %v353_v49, %v144_v61  ;;  %v265_v36 = vmul.f32 1.442695, %v262_v35 }
 0x14c   :  { %v153_v1 = vsel %vm150_vm12, %v152_v62, %v148_v63 }
 0x14d   :  { %v170_v2 = vmul.f32 %v153_v1, %v479_v15  ;;  %v250_v26 = vmul.f32 %v153_v1, %v153_v1 }
 0x14f   :  { %330 = vmatpush.xpose.msk.msra.mxu1 %vm49_vm0, %v170_v2  ;;  %v196_v3 = vmul.f32 %v171_v54, %v170_v2  ;;  %v252_v29 = vmul.f32 %v250_v26, %v484_v21 }
 0x151   :  { %v197_v4 = vsel %vm49_vm0, %v196_v3, 0.0  ;;  %v261_v32 = vmul.f32 2.0, %v252_v29 }
 0x152   :  { %331 = vmatmul.msk.f32.vlgmr.msra.gmra.mxu1 %vm49_vm0, %v170_v2  ;;  %198 = vadd.xlane.f32.xlu2 %v197_v4 }
 0x153   :  { %v263_v34 = vmul.f32 1.442695, %v261_v32 }
 0x15a   :  { %332 = vmatmul.msk.f32.gmra.mxu1 %vm49_vm0, %v171_v54  ;;  %vm254_vm0 = vcmask 130048  }
 0x1c5   :  { %v199_v5 = vpop.xlane.xlu2 %198 }
 0x1c6   :  { %v202_v6 = vsel %vm201_vm13, %v199_v5, 0.0 }
 0x1c7   :  { %203 = vadd.xlane.f32.xlu2 %v202_v6 }
 0x1cf   :  { %v236_v10 = vpop.f32.mrf.mxu1 }
 0x1d0   :  { %v242_v11 = vmul.f32 2.0, %v236_v10 }
 0x1d2   :  { %v244_v12 = vmul.f32 1.442695, %v242_v11 }
 0x1d4   :  { %354 = vpow2.f32 %v244_v12 }
 0x1d7   :  { %v239_v14 = vpop.f32.mrf.mxu1 }
 0x1d8   :  { %v243_v15 = vmul.f32 2.0, %v239_v14 }
 0x1da   :  { %v355_v17 = vpop.eup %354  ;;  %v246_v18 = vmul.f32 1.442695, %v243_v15 }
 0x1db   :  { %v248_v19 = vmul.f32 %v355_v17, %v328_v16 }
 0x1dc   :  { %356 = vpow2.f32 %v246_v18 }
 0x1dd   :  { %v255_v20 = vsel %vm254_vm0, %v248_v19, 0.0  ;;  %358 = vpow2.f32 %v263_v34 }
 0x1de   :  { %256 = vadd.xlane.f32.xlu1 %v255_v20  ;;  %360 = vpow2.f32 %v265_v36 }
 0x1e2   :  { %v357_v22 = vpop.eup %356 }
 0x1e3   :  { %v249_v23 = vmul.f32 %v357_v22, %v328_v16  ;;  %v359_v37 = vpop.eup %358 }
 0x1e4   :  { %v361_v41 = vpop.eup %360 }
 0x1e5   :  { %v258_v24 = vsel %vm254_vm0, %v249_v23, 0.0 }
 0x1e6   :  { %259 = vadd.xlane.f32.xlu1 %v258_v24 }
 0x23a   :  { %v204_v25 = vpop.xlane.xlu2 %203 }
 0x23b   :  { %v205_v27 = vrot.slane %v204_v25, 4 }
 0x23d   :  { %v206_v28 = vadd.f32 %v205_v27, %v204_v25 }
 0x23f   :  { %v207_v30 = vrot.slane %v206_v28, 2 }
 0x241   :  { %v208_v31 = vadd.f32 %v207_v30, %v206_v28 }
 0x243   :  { %v209_v0 = vrot.slane %v208_v31, 1 }
 0x245   :  { %v210_v33 = vadd.f32 %v209_v0, %v208_v31 }
 0x247   :  { %336 = vpush %v210_v33 }
 0x251   :  { %v257_v38 = vpop.xlane.xlu1 %256 }
 0x252   :  { %v267_v39 = vsub.f32 %v257_v38, %v359_v37 }
 0x254   :  { %v269_v40 = vmax.f32 %v267_v39, 1e-30 }
 0x256   :  { %362 = vlog2.f32 %v269_v40 }
 0x259   :  { %v260_v42 = vpop.xlane.xlu1 %259 }
 0x25a   :  { %v268_v43 = vsub.f32 %v260_v42, %v361_v41 }
 0x25c   :  { %v270_v21 = vmax.f32 %v268_v43, 1e-30  ;;  %v363_v44 = vpop.eup %362 }
 0x25d   :  { %v272_v45 = vmul.f32 0.6931472, %v363_v44 }
 0x25e   :  { %364 = vlog2.f32 %v270_v21 }
 0x25f   :  { %v277_v48 = vsel %vm201_vm13, %v272_v45, 0.0 }
 0x264   :  { %v365_v46 = vpop.eup %364 }
 0x265   :  { %v274_v47 = vmul.f32 0.6931472, %v365_v46 }
 0x267   :  { %v278_v49 = vsel %vm201_vm13, %v274_v47, 0.0 }
 0x268   :  { %v279_v50 = vadd.f32 %v278_v49, %v277_v48 }
 0x26a   :  { %280 = vadd.xlane.f32.xlu0 %v279_v50 }
 0x278   :  { %s337_s0 = spop %336 }
 0x279   :  { %v212_v58 = vstv %s337_s0 }
 0x27a   :  { %v290_v59 = vmul.f32 4.0, %v212_v58 }
 0x2dd   :  { %v281_v51 = vpop.xlane.xlu0 %280 }
 0x2de   :  { %v282_v52 = vrot.slane %v281_v51, 4 }
 0x2e0   :  { %v283_v53 = vadd.f32 %v282_v52, %v281_v51 }
 0x2e2   :  { %v284_v54 = vrot.slane %v283_v53, 2 }
 0x2e4   :  { %v285_v55 = vadd.f32 %v284_v54, %v283_v53 }
 0x2e6   :  { %v286_v56 = vrot.slane %v285_v55, 1 }
 0x2e8   :  { %v287_v57 = vadd.f32 %v286_v56, %v285_v55 }
 0x2ea   :  { %338 = vpush %v287_v57 }
 0x31b   :  { %s339_s1 = spop %338 }
 0x31c   :  { %v289_v60 = vstv %s339_s1 }
 0x31d   :  { %v291_v61 = vsub.f32 %v289_v60, %v290_v59 }
 0x31f   :  { %v292_v62 = vmul.f32 0.0625, %v291_v61 }
 0x321   :  { %294 = vst.msk [vmem:[#allocation8] sm:$0x1] %vm293_vm1, %v292_v62 }
 0x322   :  { %305 = dma.vmem_to_hbm [thread:$0]  %s301_s22, 16, %s303_s25, [#allocation5]  }
 0x323   :  { %442 = dma.done.wait [#allocation5], 16  }
 0x324   :  { %443 = vsyncadd [#allocation5], 4294967280 }
 0x325   :  { %310 = vsyncpa [#allocation4], 1 }
 0x326   :  { %311 = vsyncpa [#allocation7], 1 }
 0x327   :  { %312 = vsyncpa [#allocation5], 1 }

</bundles_post_ra>
